<compile_context>
chip_gen: v5e
topology: v5e:2x2
jax: 0.10.0
libtpu: 0.0.40
codegen_flags: <defaults>
</compile_context>

<pallas_src>
import functools

import jax
import jax.numpy as jnp
from jax.experimental import pallas as pl
from jax.experimental.pallas import tpu as pltpu


def _linear_intpl_kernel(x_ref, xn_ref, y_ref, *, P):
    """y[t, p*D + d] = x[t, d] + (p/P) * (x_next[t, d] - x[t, d]).

    Blocks:
      x_ref, xn_ref : (1, tile_t, D)     current / next (replication-clamped)
      y_ref         : (1, tile_t, P*D)   lane-dense output block
    """
    xc = x_ref[0].astype(jnp.float32)            # (tile_t, D)  compute in f32
    df = xn_ref[0].astype(jnp.float32) - xc      # (tile_t, D)
    # One FMA per interpolation fraction; p/P are compile-time scalar constants
    # (no captured array constants).  A single lane-concatenation produces the
    # (tile_t, P*D) value so the final store is a dense, full-lane store.
    parts = [xc] + [xc + (float(p) / P) * df for p in range(1, P)]
    y = jnp.concatenate(parts, axis=-1)          # (tile_t, P*D)
    y_ref[0] = y.astype(y_ref.dtype)


def _pick_tile_t(T, D, P, itemsize):
    """Time-tile size: multiple of 8 sublanes, working set kept around ~12 MiB
    so double-buffered blocks + f32 temporaries fit comfortably inside v7x's
    64 MiB physical / 32 MiB scoped VMEM (v5e/v6e have more headroom).
    512-1024 rows amortize the ~0.35 us per-grid-step overhead."""
    # per time-row: double-buffered in/out blocks + f32 temporaries
    per_row = 2 * itemsize * (P * D + 2 * D) + 4 * (2 * P * D + 3 * D)
    budget = 12 * 1024 * 1024
    tile_t = max(8, budget // per_row)
    tile_t = min(tile_t, 1024)
    if tile_t >= T:
        return int(T)                    # single full-extent block along time
    return int((tile_t // 8) * 8)


def linear_interpolation(x, upsampling_factor):
    """JAX/Pallas port of diffsptk.LinearInterpolation.forward.

    x: (B, N, D), (N, D) or (N,)  ->  (B, N*P, D), (N*P, D) or (N*P,)
    """
    P = int(upsampling_factor)
    assert 1 <= P
    if P == 1:
        return x

    d = x.ndim
    if d == 1:
        x3 = x.reshape(1, -1, 1)
    elif d == 2:
        x3 = x[None]
    else:
        x3 = x
    assert x3.ndim == 3, "Input must be 3D tensor"
    B, T, D = x3.shape

    # ReplicationPad1d((0, 1)): only materialize the 1-shifted "next sample"
    # stream (clamped at the end), not a full (T+1)-padded copy of the input.
    x_nxt = jnp.concatenate([x3[:, 1:, :], x3[:, -1:, :]], axis=1)  # (B, T, D)

    itemsize = jnp.dtype(x3.dtype).itemsize
    tile_t = _pick_tile_t(T, D, P, itemsize)
    nt = pl.cdiv(T, tile_t)

    kernel = functools.partial(_linear_intpl_kernel, P=P)
    cost = pl.CostEstimate(
        flops=3 * B * T * P * D,
        transcendentals=0,
        bytes_accessed=(2 * B * T * D + B * T * P * D) * itemsize,
    )

    out = pl.pallas_call(
        kernel,
        out_shape=jax.ShapeDtypeStruct((B, T, P * D), x3.dtype),
        grid=(B, nt),
        in_specs=[
            pl.BlockSpec((1, tile_t, D), lambda b, t: (b, t, 0)),
            pl.BlockSpec((1, tile_t, D), lambda b, t: (b, t, 0)),
        ],
        out_specs=pl.BlockSpec((1, tile_t, P * D), lambda b, t: (b, t, 0)),
        compiler_params=pltpu.CompilerParams(
            dimension_semantics=("parallel", "parallel"),
            vmem_limit_bytes=32 * 1024 * 1024,
        ),
        cost_estimate=cost,
    )(x3, x_nxt)

    # (B, T, P*D) and (B, T*P, D) share the same row-major memory order, so
    # this reshape is free (no data movement).
    y = out.reshape(B, T * P, D)
    if d == 1:
        y = y.reshape(-1)
    elif d == 2:
        y = y[0]
    return y


def _reference(x3, P):
    """Pure-JAX reference matching F.interpolate(mode='linear', align_corners=True)."""
    B, T, D = x3.shape
    xp = jnp.concatenate([x3, x3[:, -1:, :]], axis=1)
    frac = (jnp.arange(P, dtype=jnp.float32) / P)[None, None, :, None]
    y = x3[:, :, None, :] * (1.0 - frac) + xp[:, 1:, None, :] * frac
    return y.reshape(B, T * P, D).astype(x3.dtype)


if __name__ == "__main__":
    key = jax.random.PRNGKey(0)
    B, T, D, P = 2, 8, 32, 4
    x = jax.random.normal(key, (B, T, D), dtype=jnp.float32)

    y = jax.block_until_ready(linear_interpolation(x, P))
    assert y.shape == (B, T * P, D)

    y_ref = _reference(x, P)
    assert jnp.allclose(y, y_ref, atol=1e-6, rtol=1e-6)

    # 1-D path sanity check (matches the module's docstring example).
    x1 = jnp.asarray([0.0, 1.0, 2.0], dtype=jnp.float32)
    y1 = jax.block_until_ready(linear_interpolation(x1, 2))
    assert jnp.allclose(
        y1, jnp.asarray([0.0, 0.5, 1.0, 1.5, 2.0, 2.0], dtype=jnp.float32))

    print("KERNEL_OK")
</pallas_src>

<mosaic_0001>
module attributes {stable_mosaic.version = 11 : i64} {
  func.func @_linear_intpl_kernel(%arg0: i32, %arg1: i32, %arg2: memref<1x8x32xf32, #tpu.memory_space<vmem>>, %arg3: memref<1x8x32xf32, #tpu.memory_space<vmem>>, %arg4: memref<1x8x128xf32, #tpu.memory_space<vmem>>) attributes {dimension_semantics = [#tpu.dimension_semantics<parallel>, #tpu.dimension_semantics<parallel>], iteration_bounds = array<i64: 2, 1>, scalar_prefetch = 0 : i64, scratch_operands = 0 : i64, tpu.core_type = #tpu.core_type<tc>, window_params = [{transform_indices = @transform_0, window_bounds = array<i64: 1, 8, 32>}, {transform_indices = @transform_1, window_bounds = array<i64: 1, 8, 32>}, {transform_indices = @transform_2, window_bounds = array<i64: 1, 8, 128>}]} {
    %c0 = arith.constant 0 : index
    %c0_0 = arith.constant 0 : index
    %c0_1 = arith.constant 0 : index
    %0 = vector.load %arg2[%c0, %c0_0, %c0_1] : memref<1x8x32xf32, #tpu.memory_space<vmem>>, vector<1x8x32xf32>
    %1 = vector.shape_cast %0 : vector<1x8x32xf32> to vector<8x32xf32>
    %c0_2 = arith.constant 0 : index
    %c0_3 = arith.constant 0 : index
    %c0_4 = arith.constant 0 : index
    %2 = vector.load %arg3[%c0_2, %c0_3, %c0_4] : memref<1x8x32xf32, #tpu.memory_space<vmem>>, vector<1x8x32xf32>
    %3 = vector.shape_cast %2 : vector<1x8x32xf32> to vector<8x32xf32>
    %4 = arith.subf %3, %1 : vector<8x32xf32>
    %cst = arith.constant 2.500000e-01 : f32
    %5 = vector.broadcast %cst : f32 to vector<8x32xf32>
    %6 = arith.mulf %5, %4 : vector<8x32xf32>
    %7 = arith.addf %1, %6 : vector<8x32xf32>
    %cst_5 = arith.constant 5.000000e-01 : f32
    %8 = vector.broadcast %cst_5 : f32 to vector<8x32xf32>
    %9 = arith.mulf %8, %4 : vector<8x32xf32>
    %10 = arith.addf %1, %9 : vector<8x32xf32>
    %cst_6 = arith.constant 7.500000e-01 : f32
    %11 = vector.broadcast %cst_6 : f32 to vector<8x32xf32>
    %12 = arith.mulf %11, %4 : vector<8x32xf32>
    %13 = arith.addf %1, %12 : vector<8x32xf32>
    %14 = tpu.concatenate %1, %7, %10, %13 in 1 : vector<8x32xf32>, vector<8x32xf32>, vector<8x32xf32>, vector<8x32xf32> -> vector<8x128xf32>
    %c0_7 = arith.constant 0 : index
    %c0_8 = arith.constant 0 : index
    %c0_9 = arith.constant 0 : index
    %15 = vector.load %arg4[%c0_7, %c0_8, %c0_9] : memref<1x8x128xf32, #tpu.memory_space<vmem>>, vector<1x8x128xf32>
    %16 = vector.shape_cast %15 : vector<1x8x128xf32> to vector<8x128xf32>
    %17 = vector.shape_cast %14 : vector<8x128xf32> to vector<1x8x128xf32>
    tpu.vector_store %arg4[%c0_7, %c0_8, %c0_9], %17 {strides = array<i32>} : memref<1x8x128xf32, #tpu.memory_space<vmem>>, vector<1x8x128xf32>,
    return
  }
  func.func @transform_0(%arg0: i32, %arg1: i32) -> (i32, i32, i32) {
    %c0_i32 = arith.constant 0 : i32
    %c0_i32_0 = arith.constant 0 : i32
    return %arg0, %arg1, %c0_i32 : i32, i32, i32
  }
  func.func @transform_1(%arg0: i32, %arg1: i32) -> (i32, i32, i32) {
    %c0_i32 = arith.constant 0 : i32
    %c0_i32_0 = arith.constant 0 : i32
    return %arg0, %arg1, %c0_i32 : i32, i32, i32
  }
  func.func @transform_2(%arg0: i32, %arg1: i32) -> (i32, i32, i32) {
    %c0_i32 = arith.constant 0 : i32
    %c0_i32_0 = arith.constant 0 : i32
    return %arg0, %arg1, %c0_i32 : i32, i32, i32
  }
}

</mosaic_0001>

<bundles_post_ra>
// kernel: tpu_custom_call.1
= control target key start
LH: loop header
LB: loop body
LE: loop exit
PB: predicated region body
PF: predicated region fallthrough
CT: control target
= control target key end

     0   :  { %7 = vsyncpa [#allocation3], 0  ;;  %s754_s0 = inlined_call_operand.hbm [shape: f32[2,8,32], index: 0, kind: input, shape index: {}]   ;;  %s755_s1 = inlined_call_operand.hbm [shape: f32[2,8,32], index: 1, kind: input, shape index: {}]   ;;  %s756_s2 = inlined_call_operand.hbm [shape: f32[2,8,128], index: 2, kind: output, shape index: {}]  }
   0x1   :  { %9 = vsyncpa [#allocation3 + $0x1], 0 }
   0x2   :  { %10 = vsyncpa [#allocation6], 0 }
   0x3   :  { %12 = vsyncpa [#allocation6 + $0x1], 0 }
   0x4   :  { %13 = vsyncpa [#allocation4], 0 }
   0x5   :  { %15 = vsyncpa [#allocation4 + $0x1], 0  ;;  %s621_s9 = smov 0   ;;  %s623_s10 = smov 0  }
   0x6   :  { %s625_s11 = smov 0   ;;  %s627_s12 = smov 0  }
   0x7   :  { %s629_s13 = smov 0   ;;  %s631_s14 = smov 0  }
   0x8 LB: > { %s369_s15 = sadd.s32 4294967295, %s601_s14   ;;  %s370_s16 = sadd.s32 4294967294, %s601_s14   ;;  %s601_s14 = sphi %s631_s14, %s21_s14   ;;  %s597_s13 = sphi %s629_s13, %s765_s13   ;;  %s593_s12 = sphi %s627_s12, %s764_s12   ;;  %s589_s11 = sphi %s625_s11, %s763_s11   ;;  %s585_s10 = sphi %s623_s10, %s762_s10   ;;  %s581_s9 = sphi %s621_s9, %s761_s9  }
   0x9   : > { %s33_s17 = sadd.s32 1, %s597_s13  ;;  %s42_s18 = sadd.s32 1, %s589_s11 }
   0xa   : > { %p35_p0 = scmp.ge.s32.totalorder %s33_s17, 2  ;;  %p49_p1 = scmp.ne.s32.totalorder %s589_s11, %s585_s10 }
   0xb   : > { %p50_p2 = scmp.eq.s32.totalorder %s601_s14, 0  ;;  %p55_p3 = scmp.ne.s32.totalorder %s585_s10, %s581_s9 }
   0xc   : > { %s767_s17 = smov (%p35_p0, %s33_s17), 0  ;;  %p56_p5 = scmp.eq.s32.totalorder %s369_s15, 0 }
   0xd   : > { %p662_p4 = por %p50_p2, %p49_p1  ;;  %s37_s20 = ssub.s32 %s597_s13, %s767_s17 }
   0xe   : > { %p109_p6 = scmp.eq.s32.totalorder %s369_s15, 1  ;;  %p40_p7 = scmp.eq.s32.totalorder %s37_s20, 0 }
   0xf   : > { %p668_p8 = por %p56_p5, %p55_p3  ;;  %p115_p10 = scmp.eq.s32.totalorder %s370_s16, 1 }
  0x10   : > { %p672_p9 = por %p109_p6, %p49_p1  ;;  %p372_p12 = scmp.ge.s32.totalorder %s601_s14, 2 }
  0x11   : > { %s677_s23 = scalar_select %p40_p7, %s589_s11, %s42_s18  }
  0x12   : > { %p679_p11 = por %p115_p10, %p55_p3  ;;  %p402_p13 = scmp.lt.s32.totalorder %s601_s14, 2 }
  0x13   : > { %s135_s25 = sand.u32 1, %s589_s11   ;;  %s374_s27 = sshll.u32 %s597_s13, 3 }
  0x14   : > { %s373_s26 = sshll.u32 %s135_s25, 3  ;;  %s144_s30 = scalar_lea.hbm %s754_s0, %s374_s27 }
  0x15   : > { %s139_s3 = scalar_lea.vmem [#allocation2], %s373_s26  ;;  %s146_s5 = sshll.u32 %s144_s30, 4  ;;  %s147_s5 = int_to_ptr.hbm [resolvable:$true] %s146_s5 }
  0x16   : > { %s148_s4 = sshll.u32 %s139_s3, 4  ;;  %p392_p0 = pnand %p402_p13, %p662_p4  ;;  %s149_s4 = int_to_ptr.vmem [resolvable:$true] %s148_s4 }
  0x17   : > { %p377_p1 = scmp.ge.s32.totalorder %s601_s14, 1  ;;  %p173_p2 = scmp.lt.s32.totalorder %s601_s14, 3 }
  0x18   : > { %s136_s6 = scalar_lea.sflag [#allocation3], %s135_s25  ;;  %s164_s15 = scalar_lea.hbm %s755_s1, %s374_s27 }
  0x19   : > { %394 = dma.hbm_to_vmem [thread:$0]  (!%p392_p0), %s147_s5, 128, %s149_s4, %s136_s6  }
  0x1a   : > { %p174_p3 = pnand %p377_p1, %p173_p2  ;;  %s159_s16 = scalar_lea.vmem [#allocation5], %s373_s26 }
  0x1b   : > { %s168_s18 = sshll.u32 %s159_s16, 4  ;;  %s166_s20 = sshll.u32 %s164_s15, 4  ;;  %s169_s18 = int_to_ptr.vmem [resolvable:$true] %s168_s18  ;;  %s167_s20 = int_to_ptr.hbm [resolvable:$true] %s166_s20 }
  0x1c   : > { %s156_s28 = scalar_lea.sflag [#allocation6], %s135_s25  ;;  %177 = sbr.rel (%p174_p3) target bundleno = 171 (0xab), region = 28 }
  0x1d   : > { %397 = dma.hbm_to_vmem [thread:$0]  (!%p392_p0), %s167_s20, 128, %s169_s18, %s156_s28  }
  0x1e   : > { %s698_s19 = sand.u32 (!%p174_p3), 1, %s585_s10  }
  0x1f   : > { %s701_s29 = sshll.u32 (!%p174_p3), %s698_s19, 3  ;;  %s180_s30 = scalar_lea.sflag (!%p174_p3), [#allocation3], %s698_s19 }
  0x20   : > { %s183_s3 = scalar_lea.vmem (!%p174_p3), [#allocation2], %s701_s29 }
  0x21   : > { %568 = dma.done.wait (%p668_p8), %s180_s30, 128  }
  0x22   : > { %570 = vsyncadd (%p668_p8), %s180_s30, 4294967168  ;;  %s190_s25 = scalar_lea.sflag [#allocation6], %s698_s19  ;;  %s193_s26 = scalar_lea.vmem [#allocation5], %s701_s29 }
  0x23   : > { %572 = dma.done.wait (%p668_p8), %s190_s25, 128  }
  0x24   : > { %574 = vsyncadd (%p668_p8), %s190_s25, 4294967168  ;;  %v220_v0 = vld [vmem:[%s183_s3] sm:$0xff]  ;;  %v221_v1 = vld [vmem:[%s193_s26] sm:$0xff]  ;;  %s603_s27 = smov 32   ;;  %s604_s4 = smov 96   ;;  %vm241_vm0 = vcmask 261120  }
  0x25   : > { %v222_v2 = vsub.f32 %v221_v1, %v220_v0  ;;  %s605_s5 = smov 64   ;;  %s382_s21 = sshll.u32 %s593_s12, 3  ;;  %vm243_vm1 = vcmask 523264   ;;  %vm245_vm2 = vcmask 785408  }
  0x26   : > { %s260_s8 = scalar_lea.hbm %s756_s2, %s382_s21  ;;  %s219_s15 = scalar_lea.vmem [#allocation7], %s701_s29 }
  0x27   : > { %v223_v3 = vmul.f32 0.25, %v222_v2  ;;  %v227_v4 = vmul.f32 0.75, %v222_v2  ;;  %v225_v7 = vmul.f32 0.5, %v222_v2  ;;  %s262_s16 = sshll.u32 %s219_s15, 4  ;;  %s264_s18 = sshll.u32 %s260_s8, 4  ;;  %s263_s16 = int_to_ptr.vmem [resolvable:$true] %s262_s16  ;;  %s265_s18 = int_to_ptr.hbm [resolvable:$true] %s264_s18 }
  0x28   : > { %s249_s12 = scalar_lea.sflag [#allocation4], %s698_s19  ;;  %s529_s20 = sshra.s32 %s265_s18, 4  ;;  %s530_s20 = int_to_ptr.hbm [resolvable:$true] %s529_s20 }
  0x29   : > { %v224_v5 = vadd.f32 %v223_v3, %v220_v0  ;;  %v228_v6 = vadd.f32 %v227_v4, %v220_v0  ;;  %v226_v8 = vadd.f32 %v225_v7, %v220_v0  ;;  %s531_s28 = scalar_lea.hbm %s530_s20, 8  ;;  %s535_s3 = scalar_lea.hbm %s756_s2, 16 }
  0x2a   : > { %p532_p4 = scmp.ne.s32.totalorder %s530_s20, %s531_s28  ;;  %p536_p7 = scmp.lt.s32.totalorder %s530_s20, %s756_s2 }
  0x2b   : > { %230 = vrot.lane.b32.xlu0 %v224_v5, %s603_s27  ;;  %238 = vrot.lane.b32.xlu1 %v228_v6, %s604_s4  ;;  %p537_p8 = scmp.lt.s32.totalorder %s535_s3, %s531_s28 }
  0x2c   : > { %p533_p5 = pnand %p532_p4, %p672_p9 }
  0x2d   : > { %p538_p10 = por %p537_p8, %p536_p7 }
  0x2e   : > { %p534_p6 = pneg %p533_p5 }
  0x30   : > { %p539_p13 = pnand %p538_p10, %p534_p6 }
  0x33   : > { %234 = vrot.lane.b32.xlu0 %v226_v8, %s605_s5 }
  0x9d   : > { %v231_v9 = vpop.permute.xlu0 %230  ;;  %v239_v10 = vpop.permute.xlu1 %238 }
  0x9e   : > { %v242_v11 = vsel %vm241_vm0, %v220_v0, %v231_v9 }
  0xa5   : > { %v235_v12 = vpop.permute.xlu0 %234 }
  0xa6   : > { %v244_v13 = vsel %vm243_vm1, %v242_v11, %v235_v12 }
  0xa7   : > { %v246_v14 = vsel %vm245_vm2, %v244_v13, %v239_v10 }
  0xa8   : > { %247 = vst [vmem:[%s219_s15] sm:$0xff] %v246_v14 }
  0xa9   : > { %542 = shalt.err (!%p539_p13)
}
  0xaa   : > { %389 = dma.vmem_to_hbm [thread:$0]  (%p672_p9), %s263_s16, 128, %s265_s18, %s249_s12  }
  0xab PF: > { %s276_s19 = sand.u32 1, %s581_s9   ;;  %p399_p0 = pnand %p372_p12, %p679_p11 }
  0xac   : > { %s277_s27 = scalar_lea.sflag [#allocation4], %s276_s19 }
  0xad   : > { %p400_p1 = pneg %p399_p0 }
  0xaf   : > { %576 = dma.done.wait (%p400_p1), %s277_s27, 128  }
  0xb0   : > { %578 = vsyncadd (%p400_p1), %s277_s27, 4294967168  ;;  %s21_s14 = sadd.s32 1, %s601_s14   ;;  %s761_s9 = smov %s585_s10 }
  0xb1   : > { %p18_p2 = scmp.ge.s32.totalorder %s21_s14, 4   ;;  %s762_s10 = smov %s589_s11 }
  0xb2   : > { %s763_s11 = smov %s677_s23  ;;  %s764_s12 = smov %s597_s13 }
  0xb3   : > { %s765_s13 = smov %s767_s17  ;;  %20 = sbr.rel (!%p18_p2) target bundleno = 8 (0x8), region = 86 }
  0xb8   :  { %283 = vsyncpa [#allocation3], 1 }
  0xb9   :  { %285 = vsyncpa [#allocation3 + $0x1], 1 }
  0xba   :  { %286 = vsyncpa [#allocation6], 1 }
  0xbb   :  { %288 = vsyncpa [#allocation6 + $0x1], 1 }
  0xbc   :  { %289 = vsyncpa [#allocation4], 1 }
  0xbd   :  { %291 = vsyncpa [#allocation4 + $0x1], 1 }

</bundles_post_ra>
